<compile_context>
chip_gen: v7x
topology: tpu7x:2x2x1
jax: 0.10.0
libtpu: 0.0.40
codegen_flags: <defaults>
</compile_context>

<pallas_src>
import functools

import numpy as np
import jax
import jax.numpy as jnp
from jax.experimental import pallas as pl
from jax.experimental.pallas import tpu as pltpu


# ----------------------------------------------------------------------------
# Kernel: fused (folded-Linear -> SiLU -> output Linear -> sigmoid) on a pixel tile,
# for Bsub stacked batch elements at a time.
# ----------------------------------------------------------------------------
def _decoder_kernel(xT_ref, w_ref, w2_ref, b2_ref, out_ref, *, bsub, fc_dim):
    # xT_ref : (d_aug, tile_n)          coords + PE + ones row, pixels on lanes
    # w_ref  : (G, bsub*fc_dim, d_aug)  folded per-batch weights (bias = last column), resident
    # w2_ref : (fc_dim, 1)              output-layer weight column
    # b2_ref : (1, 1)                   output-layer bias
    # out_ref: (1, bsub, tile_n)
    g = pl.program_id(1)
    x = xT_ref[...]                                               # (d_aug, tile_n)
    w = w_ref[g]                                                  # (bsub*fc_dim, d_aug)

    # Layer 1 (Linear + FiLM + BatchNorm(eval) + bias folded) for all bsub batches at once.
    h = jnp.dot(w, x, preferred_element_type=jnp.float32)         # (bsub*fc_dim, tile_n)
    h = h * jax.nn.sigmoid(h)                                     # SiLU ('sine' activation)

    # Output layer (fc_dim -> 1) per batch: VPU multiply + cross-sublane reduce (MXU stays free).
    hb = h.reshape(bsub, fc_dim, h.shape[-1])                     # (bsub, fc_dim, tile_n)
    o = jnp.sum(hb * w2_ref[...][None, :, :], axis=1)             # (bsub, tile_n)
    out_ref[0] = jax.nn.sigmoid(o + b2_ref[...])


# ----------------------------------------------------------------------------
# Constant per-pixel features (coords + positional encoding), matching PyTorch:
#   x,y = meshgrid(linspace(0,1,S), linspace(0,1,S), indexing='ij')
#   coords = stack([x.flatten(), y.flatten()], -1); pe = [sin(2^i*pi*c), cos(2^i*pi*c)]
# ----------------------------------------------------------------------------
def _coords_and_pe(img_size, pe_dim):
    lin = jnp.linspace(0.0, 1.0, img_size)
    xx, yy = jnp.meshgrid(lin, lin, indexing='ij')
    coords = jnp.stack([xx.reshape(-1), yy.reshape(-1)], axis=-1)        # (N, 2)
    feats = [coords]
    for i in range(pe_dim):
        feats.append(jnp.sin((2.0 ** i) * np.pi * coords))
        feats.append(jnp.cos((2.0 ** i) * np.pi * coords))
    return jnp.concatenate(feats, axis=-1).astype(jnp.float32)           # (N, 2 + 4*pe_dim)


def _round_up(x, m):
    return ((x + m - 1) // m) * m


def _pick_bsub(B, fc_dim, max_rows=256):
    """Largest divisor of B such that bsub*fc_dim <= max_rows (fills MXU rows)."""
    best = 1
    for d in range(1, B + 1):
        if B % d == 0 and d * fc_dim <= max_rows:
            best = d
    return best


def implicit_neural_decoder(context, params, *, img_size, pe_dim, max_tile_n=4096):
    """context: (B, latent_dim) float32 -> (B, 1, img_size, img_size)."""
    B = context.shape[0]
    N = img_size * img_size
    d_in, fc_dim = params['w1'].shape
    d_aug = d_in + 1

    # Lane tiling: pixels rounded up to a multiple of 128; zero-padded tail sliced off later.
    tile_n = min(max_tile_n, _round_up(N, 128))
    n_tiles = pl.cdiv(N, tile_n)
    n_pad = n_tiles * tile_n

    # Batch stacking: fill the MXU M axis (<= 256 rows) with whole batch elements.
    bsub = _pick_bsub(B, fc_dim, max_rows=256)
    n_groups = B // bsub

    # Transposed coords+PE table, pixels on lanes, plus a ones row for the folded bias.
    coords_t = _coords_and_pe(img_size, pe_dim).T                        # (d_in, N)
    x_aug = jnp.concatenate([coords_t, jnp.ones((1, N), jnp.float32)], axis=0)  # (d_aug, N)
    if n_pad != N:
        x_aug = jnp.pad(x_aug, ((0, 0), (0, n_pad - N)))

    # FiLM generator (tiny per-batch MLP; same value for every pixel -> wrapper glue).
    hf = jnp.maximum(context @ params['film_w1'] + params['film_b1'], 0.0)
    film = hf @ params['film_w2'] + params['film_b2']                    # (B, 2*fc_dim)
    gamma, beta = jnp.split(film, 2, axis=-1)                            # (B, fc_dim) x2
    gamma = gamma.astype(jnp.float32)
    beta = beta.astype(jnp.float32)

    # BatchNorm (eval) folded to scale/shift.
    eps = 1e-5
    bn_scale = params['bn_weight'] / jnp.sqrt(params['bn_running_var'] + eps)   # (fc_dim,)
    bn_shift = params['bn_bias'] - params['bn_running_mean'] * bn_scale          # (fc_dim,)

    # Fold Linear + FiLM + BN (+ bias as an extra weight column) into per-batch weights.
    col_scale = gamma * bn_scale[None, :]                                # (B, fc_dim)
    w1eff_t = params['w1'].T[None, :, :] * col_scale[:, :, None]         # (B, fc_dim, d_in)
    b_eff = ((params['b1'][None, :] * gamma + beta) * bn_scale[None, :]
             + bn_shift[None, :])                                        # (B, fc_dim)
    w_aug = jnp.concatenate([w1eff_t, b_eff[:, :, None]], axis=-1)       # (B, fc_dim, d_aug)
    w_stacked = w_aug.reshape(n_groups, bsub * fc_dim, d_aug).astype(jnp.float32)

    w2_col = params['w2'].astype(jnp.float32)                            # (fc_dim, 1)
    b2 = params['b2'].reshape(1, 1).astype(jnp.float32)                  # (1, 1)

    kernel = functools.partial(_decoder_kernel, bsub=bsub, fc_dim=fc_dim)

    # Batch-group axis innermost: the coords tile block index is constant over it (no re-DMA).
    grid = (n_tiles, n_groups)
    out = pl.pallas_call(
        kernel,
        out_shape=jax.ShapeDtypeStruct((n_groups, bsub, n_pad), jnp.float32),
        grid=grid,
        in_specs=[
            pl.BlockSpec((d_aug, tile_n), lambda n, g: (0, n)),           # coords+PE+ones tile
            pl.BlockSpec((n_groups, bsub * fc_dim, d_aug),
                         lambda n, g: (0, 0, 0)),                         # weights, VMEM-resident
            pl.BlockSpec((fc_dim, 1), lambda n, g: (0, 0)),               # w2 column
            pl.BlockSpec((1, 1), lambda n, g: (0, 0)),                    # b2
        ],
        out_specs=pl.BlockSpec((1, bsub, tile_n), lambda n, g: (g, 0, n)),  # dense stores
        compiler_params=pltpu.CompilerParams(
            dimension_semantics=("parallel", "parallel")),
    )(x_aug, w_stacked, w2_col, b2)

    out = out.reshape(B, n_pad)[:, :N]
    return out.reshape(B, 1, img_size, img_size)


# ----------------------------------------------------------------------------
# Deterministic parameter construction (PyTorch-Linear-style uniform init).
# ----------------------------------------------------------------------------
def init_params(key, latent_dim, d_in, fc_dim):
    def linear(key, fan_in, fan_out):
        k1, k2 = jax.random.split(key)
        bound = 1.0 / np.sqrt(fan_in)
        w = jax.random.uniform(k1, (fan_in, fan_out), jnp.float32, -bound, bound)
        b = jax.random.uniform(k2, (fan_out,), jnp.float32, -bound, bound)
        return w, b

    ks = jax.random.split(key, 4)
    film_w1, film_b1 = linear(ks[0], latent_dim, 64)
    film_w2, film_b2 = linear(ks[1], 64, 2 * fc_dim)
    w1, b1 = linear(ks[2], d_in, fc_dim)
    w2, b2 = linear(ks[3], fc_dim, 1)
    return dict(
        film_w1=film_w1, film_b1=film_b1, film_w2=film_w2, film_b2=film_b2,
        w1=w1, b1=b1, w2=w2, b2=b2,
        bn_weight=jnp.ones((fc_dim,), jnp.float32),
        bn_bias=jnp.zeros((fc_dim,), jnp.float32),
        bn_running_mean=jnp.zeros((fc_dim,), jnp.float32),
        bn_running_var=jnp.ones((fc_dim,), jnp.float32),
    )


# ----------------------------------------------------------------------------
# Pure-JAX reference (mirrors the PyTorch forward, no weight folding).
# ----------------------------------------------------------------------------
def reference(context, params, *, img_size, pe_dim):
    B = context.shape[0]
    N = img_size * img_size
    coords_feat = _coords_and_pe(img_size, pe_dim)                       # (N, d_in)
    x = jnp.broadcast_to(coords_feat[None], (B, N, coords_feat.shape[1])).reshape(B * N, -1)
    ctx = jnp.broadcast_to(context[:, None, :], (B, N, context.shape[1])).reshape(B * N, -1)
    h = jnp.maximum(ctx @ params['film_w1'] + params['film_b1'], 0.0)
    film = h @ params['film_w2'] + params['film_b2']
    gamma, beta = jnp.split(film, 2, axis=-1)
    y = x @ params['w1'] + params['b1']
    y = gamma * y + beta
    eps = 1e-5
    y = ((y - params['bn_running_mean']) / jnp.sqrt(params['bn_running_var'] + eps)
         * params['bn_weight'] + params['bn_bias'])
    y = y * jax.nn.sigmoid(y)                                            # SiLU
    o = jax.nn.sigmoid(y @ params['w2'] + params['b2'])
    return o.reshape(B, 1, img_size, img_size)


if __name__ == "__main__":
    # Small, module-consistent shapes.
    batch = 2
    latent_dim = 2
    img_size = 16
    pe_dim = 4
    fc_dim = 32                      # fc_dims = [32]
    d_in = 2 + 4 * pe_dim            # input_dim (use_film=True)

    key = jax.random.PRNGKey(0)
    k_ctx, k_par = jax.random.split(key)
    context = jax.random.normal(k_ctx, (batch, latent_dim), jnp.float32)
    params = init_params(k_par, latent_dim, d_in, fc_dim)

    out = implicit_neural_decoder(context, params, img_size=img_size, pe_dim=pe_dim)
    out = jax.block_until_ready(out)

    ref = reference(context, params, img_size=img_size, pe_dim=pe_dim)
    assert out.shape == (batch, 1, img_size, img_size)
    np.testing.assert_allclose(np.asarray(out), np.asarray(ref), rtol=1e-4, atol=1e-4)

    print("KERNEL_OK")
</pallas_src>

<mosaic_0001>
module attributes {stable_mosaic.version = 11 : i64} {
  func.func @_decoder_kernel(%arg0: i32, %arg1: i32, %arg2: memref<19x256xf32, #tpu.memory_space<vmem>>, %arg3: memref<1x64x19xf32, #tpu.memory_space<vmem>>, %arg4: memref<32x1xf32, #tpu.memory_space<vmem>>, %arg5: memref<1x1xf32, #tpu.memory_space<vmem>>, %arg6: memref<1x2x256xf32, #tpu.memory_space<vmem>>) attributes {dimension_semantics = [#tpu.dimension_semantics<parallel>, #tpu.dimension_semantics<parallel>], iteration_bounds = array<i64: 1, 1>, scalar_prefetch = 0 : i64, scratch_operands = 0 : i64, tpu.core_type = #tpu.core_type<tc>, window_params = [{transform_indices = @transform_0, window_bounds = array<i64: 19, 256>}, {pipeline_mode = #tpu.pipeline_mode<synchronous>, transform_indices = @transform_1, window_bounds = array<i64: 1, 64, 19>}, {pipeline_mode = #tpu.pipeline_mode<synchronous>, transform_indices = @transform_2, window_bounds = array<i64: 32, 1>}, {pipeline_mode = #tpu.pipeline_mode<synchronous>, transform_indices = @transform_3, window_bounds = array<i64: 1, 1>}, {transform_indices = @transform_4, window_bounds = array<i64: 1, 2, 256>}]} {
    %c0 = arith.constant 0 : index
    %c0_0 = arith.constant 0 : index
    %0 = vector.load %arg2[%c0, %c0_0] : memref<19x256xf32, #tpu.memory_space<vmem>>, vector<19x256xf32>
    %1 = arith.index_cast %arg1 : i32 to index
    %c0_1 = arith.constant 0 : index
    %c0_2 = arith.constant 0 : index
    %2 = vector.load %arg3[%1, %c0_1, %c0_2] : memref<1x64x19xf32, #tpu.memory_space<vmem>>, vector<1x64x19xf32>
    %3 = vector.shape_cast %2 : vector<1x64x19xf32> to vector<64x19xf32>
    %cst = arith.constant dense<0.000000e+00> : vector<64x256xf32>
    %4 = tpu.matmul %3, %0, %cst {dimension_numbers = #tpu.dot_dimension_numbers<[1], [0], [0], [1], [0, 0, 1, 1], [], []>} : vector<64x19xf32>, vector<19x256xf32>, vector<64x256xf32> -> vector<64x256xf32>
    %5 = arith.negf %4 : vector<64x256xf32>
    %6 = math.exp %5 : vector<64x256xf32>
    %cst_3 = arith.constant 1.000000e+00 : f32
    %7 = vector.broadcast %cst_3 : f32 to vector<64x256xf32>
    %8 = arith.addf %7, %6 : vector<64x256xf32>
    %9 = arith.divf %7, %8 : vector<64x256xf32>
    %10 = arith.mulf %4, %9 : vector<64x256xf32>
    %11 = vector.shape_cast %10 : vector<64x256xf32> to vector<2x32x256xf32>
    %c0_4 = arith.constant 0 : index
    %c0_5 = arith.constant 0 : index
    %12 = vector.load %arg4[%c0_4, %c0_5] : memref<32x1xf32, #tpu.memory_space<vmem>>, vector<32x1xf32>
    %13 = vector.shape_cast %12 : vector<32x1xf32> to vector<1x32x1xf32>
    %14 = vector.broadcast %13 : vector<1x32x1xf32> to vector<2x32x256xf32>
    %15 = arith.mulf %11, %14 : vector<2x32x256xf32>
    %cst_6 = arith.constant dense<0.000000e+00> : vector<2x256xf32>
    %16 = vector.multi_reduction <add>, %15, %cst_6 [1] : vector<2x32x256xf32> to vector<2x256xf32>
    %c0_7 = arith.constant 0 : index
    %c0_8 = arith.constant 0 : index
    %17 = vector.load %arg5[%c0_7, %c0_8] : memref<1x1xf32, #tpu.memory_space<vmem>>, vector<1x1xf32>
    %18 = vector.broadcast %17 : vector<1x1xf32> to vector<2x256xf32>
    %19 = arith.addf %16, %18 : vector<2x256xf32>
    %20 = arith.negf %19 : vector<2x256xf32>
    %21 = math.exp %20 : vector<2x256xf32>
    %cst_9 = arith.constant 1.000000e+00 : f32
    %22 = vector.broadcast %cst_9 : f32 to vector<2x256xf32>
    %23 = arith.addf %22, %21 : vector<2x256xf32>
    %24 = arith.divf %22, %23 : vector<2x256xf32>
    %c0_10 = arith.constant 0 : index
    %c0_11 = arith.constant 0 : index
    %c0_12 = arith.constant 0 : index
    %25 = vector.load %arg6[%c0_10, %c0_11, %c0_12] : memref<1x2x256xf32, #tpu.memory_space<vmem>>, vector<1x2x256xf32>
    %26 = vector.shape_cast %25 : vector<1x2x256xf32> to vector<2x256xf32>
    %27 = vector.shape_cast %24 : vector<2x256xf32> to vector<1x2x256xf32>
    tpu.vector_store %arg6[%c0_10, %c0_11, %c0_12], %27 {strides = array<i32>} : memref<1x2x256xf32, #tpu.memory_space<vmem>>, vector<1x2x256xf32>,
    return
  }
  func.func @transform_0(%arg0: i32, %arg1: i32) -> (i32, i32) {
    %c0_i32 = arith.constant 0 : i32
    %c0_i32_0 = arith.constant 0 : i32
    return %c0_i32, %arg0 : i32, i32
  }
  func.func @transform_1(%arg0: i32, %arg1: i32) -> (i32, i32, i32) {
    %c0_i32 = arith.constant 0 : i32
    %c0_i32_0 = arith.constant 0 : i32
    %c0_i32_1 = arith.constant 0 : i32
    %c0_i32_2 = arith.constant 0 : i32
    return %c0_i32, %c0_i32_0, %c0_i32_1 : i32, i32, i32
  }
  func.func @transform_2(%arg0: i32, %arg1: i32) -> (i32, i32) {
    %c0_i32 = arith.constant 0 : i32
    %c0_i32_0 = arith.constant 0 : i32
    %c0_i32_1 = arith.constant 0 : i32
    return %c0_i32, %c0_i32_0 : i32, i32
  }
  func.func @transform_3(%arg0: i32, %arg1: i32) -> (i32, i32) {
    %c0_i32 = arith.constant 0 : i32
    %c0_i32_0 = arith.constant 0 : i32
    %c0_i32_1 = arith.constant 0 : i32
    return %c0_i32, %c0_i32_0 : i32, i32
  }
  func.func @transform_4(%arg0: i32, %arg1: i32) -> (i32, i32, i32) {
    %c0_i32 = arith.constant 0 : i32
    %c0_i32_0 = arith.constant 0 : i32
    return %arg1, %c0_i32, %arg0 : i32, i32, i32
  }
}

</mosaic_0001>

<bundles_post_ra>
// kernel: tpu_custom_call.1
= control target key start
LH: loop header
LB: loop body
LE: loop exit
PB: predicated region body
PF: predicated region fallthrough
CT: control target
= control target key end

     0   :  { %s779_s0 = inlined_call_operand.vmem [shape: f32[19,256], index: 0, kind: input, shape index: {}]   ;;  %s780_s1 = inlined_call_operand.vmem [shape: f32[1,64,19], index: 1, kind: input, shape index: {}]   ;;  %s781_s2 = inlined_call_operand.vmem [shape: f32[32,1], index: 2, kind: input, shape index: {}]   ;;  %s782_s3 = inlined_call_operand.<no memory space> [shape: f32[1,1], index: 3, kind: input, shape index: {}]   ;;  %s783_s4 = inlined_call_operand.hbm [shape: f32[1,2,256], index: 4, kind: output, shape index: {}]  }
   0x1   :  { %v9_v0 = vstv %s782_s3 }
   0x2   :  { %10 = vst [vmem:[#allocation2] sm:$0x1] %v9_v0 }
   0x3   :  { %v21_v1 = vld [vmem:[%s779_s0 + $0x8] sm:$0xff]  ;;  %v23_v2 = vld [vmem:[%s779_s0 + $0x18] sm:$0xff]  ;;  %v20_v3 = vld [vmem:[%s779_s0] sm:$0xff]  ;;  %v605_v6 = vmov 0.0   ;;  %vm61_vm0 = vcmask 1042432   ;;  %v606_v9 = vmov 0  }
   0x4   :  { %v487_v4 = vpack.c.bf16 %v23_v2, %v21_v1  ;;  %v22_v5 = vld [vmem:[%s779_s0 + $0x10] sm:$0xff]  ;;  %132 = vmatprep.mubr.f32.mxu0 %v605_v6  ;;  %156 = vmatprep.mubr.f32.mxu1 %v605_v6  ;;  %v25_v8 = vld [vmem:[%s779_s0 + $0x28] sm:$0x7]  ;;  %v293_v10 = vld [vmem:[%s781_s2] sm:$0xff]  ;;  %vm36_vm1 = vcmask 154624  }
   0x5   :  { %v489_v7 = vpack.c.bf16 %v22_v5, %v20_v3  ;;  %499 = vset.pattern.permute.xlu0 %v606_v9  ;;  %500 = vset.pattern.permute.xlu1 %v606_v9  ;;  %v24_v11 = vld [vmem:[%s779_s0 + $0x20] sm:$0x7]  ;;  %v295_v12 = vld [vmem:[%s781_s2 + $0x10] sm:$0xff] }
   0x6   :  { %488 = vmatprep.subr.bf16.mxu0 %v487_v4  ;;  %491 = vmatprep.subr.bf16.mxu1 %v487_v4  ;;  %v28_v13 = vld [vmem:[%s780_s1] sm:$0xff] }
   0x7   :  { %490 = vmatpush1.bf16.msra.mxu0 %v489_v7  ;;  %493 = vmatpush1.bf16.msra.mxu1 %v489_v7  ;;  %v32_v14 = vld [vmem:[%s780_s1 + $0x20] sm:$0xff] }
   0x8   :  { %456 = vmatprep.subr.msk.mxu0 %vm61_vm0, %v25_v8  ;;  %492 = vmatprep.subr.msk.mxu1 %vm61_vm0, %v25_v8 }
   0x9   :  { %299 = vperm.xlu0 %499, %v293_v10   ;;  %309 = vperm.xlu1 %500, %v295_v12  }
   0xa   :  { %11 = vsyncpa [#allocation4], 0  ;;  %v294_v15 = vld [vmem:[%s781_s2 + $0x8] sm:$0xff]  ;;  %v296_v16 = vld [vmem:[%s781_s2 + $0x18] sm:$0xff]  ;;  %vm432_vm2 = vcmask 1041409   ;;  %vm434_vm3 = vcmask 1043459  }
   0xb   :  { %457 = vmatpush1.msk.msra.mxu0 %vm61_vm0, %v24_v11  ;;  %494 = vmatpush1.msk.msra.mxu1 %vm61_vm0, %v24_v11  ;;  %v29_v17 = vld [vmem:[%s780_s1 + $0x8] sm:$0xff]  ;;  %v482_v19 = vld [vmem:[#allocation2] ss:$0 sm:$0xff]  ;;  %v30_v20 = vld [vmem:[%s780_s1 + $0x10] sm:$0xff]  ;;  %vm436_vm4 = vcmask 1045509   ;;  %vm438_vm5 = vcmask 1047559  }
   0xc   :  { %458 = vmatmul.mubr.msk.f32.vlgmr.msra.gmra.mrb[0].mxu0 %vm36_vm1, %v28_v13  ;;  %462 = vmatmul.mubr.msk.f32.vlgmr.msra.gmra.mrb[0].mxu1 %vm36_vm1, %v32_v14  ;;  %v33_v18 = vld [vmem:[%s780_s1 + $0x28] sm:$0xff]  ;;  %v34_v21 = vld [vmem:[%s780_s1 + $0x30] sm:$0xff]  ;;  %v31_v22 = vld [vmem:[%s780_s1 + $0x18] sm:$0xff] }
   0xd   :  { %138 = vmatprep.mubr.f32.mxu0 %v605_v6  ;;  %162 = vmatprep.mubr.f32.mxu1 %v605_v6  ;;  %v35_v23 = vld [vmem:[%s780_s1 + $0x38] sm:$0xff]  ;;  %s608_s1 = smov [#allocation3]  }
   0xe   :  { %304 = vperm.xlu0 %499, %v294_v15   ;;  %314 = vperm.xlu1 %500, %v296_v16   ;;  %s448_s24 = sshll.u32 %s608_s1, 4  ;;  %s449_s24 = int_to_ptr.vmem [resolvable:$true] %s448_s24 }
   0xf   :  { %s581_s3 = scalar_lea.vmem %s449_s24, 64  ;;  %p586_p1 = scmp.lt.s32.totalorder %s449_s24, %s449_s24 }
  0x10   :  { %459 = vmatmul.mubr.msk.f32.gmra.mrb[2].mxu0 %vm36_vm1, %v29_v17  ;;  %463 = vmatmul.mubr.msk.f32.gmra.mrb[2].mxu1 %vm36_vm1, %v33_v18  ;;  %p582_p0 = scmp.ne.s32.totalorder %s449_s24, %s581_s3  ;;  %p587_p2 = scmp.lt.s32.totalorder %s581_s3, %s581_s3 }
  0x11   :  { %144 = vmatprep.mubr.f32.mxu0 %v605_v6  ;;  %168 = vmatprep.mubr.f32.mxu1 %v605_v6 }
  0x12   :  { %376 = vperm.xlu0 %499, %v482_v19   ;;  %p588_p3 = por %p587_p2, %p586_p1 }
  0x14   :  { %460 = vmatmul.mubr.msk.f32.gmra.mrb[4].mxu0 %vm36_vm1, %v30_v20  ;;  %464 = vmatmul.mubr.msk.f32.gmra.mrb[4].mxu1 %vm36_vm1, %v34_v21  ;;  %p589_p4 = pnand %p588_p3, %p582_p0 }
  0x15   :  { %150 = vmatprep.mubr.f32.mxu0 %v605_v6  ;;  %174 = vmatprep.mubr.f32.mxu1 %v605_v6 }
  0x18   :  { %461 = vmatmul.mubr.msk.f32.gmra.mrb[6].mxu0 %vm36_vm1, %v31_v22  ;;  %465 = vmatmul.mubr.msk.f32.gmra.mrb[6].mxu1 %vm36_vm1, %v35_v23 }
  0x88   :  { %v300_v18 = vpop.permute.xlu0 %299 }
  0xdf   :  { %v703_v24 = vpop.f32.mrb[0].mxu0  ;;  %v705_v25 = vpop.f32.mrb[0].mxu1 }
  0xe0   :  { %v466_v26 = vmul.f32 -1.442695, %v703_v24  ;;  %v474_v27 = vmul.f32 -1.442695, %v705_v25  ;;  %v709_v28 = vpop.f32.mrb[1].mxu0  ;;  %v711_v29 = vpop.f32.mrb[1].mxu1 }
  0xe1   :  { %v467_v30 = vmul.f32 -1.442695, %v709_v28  ;;  %v475_v31 = vmul.f32 -1.442695, %v711_v29 }
  0xe2   :  { %501 = vpow2.f32 %v466_v26 }
  0xe3   :  { %503 = vpow2.f32 %v474_v27  ;;  %v715_v32 = vpop.f32.mrb[2].mxu0  ;;  %v717_v33 = vpop.f32.mrb[2].mxu1 }
  0xe4   :  { %505 = vpow2.f32 %v467_v30  ;;  %v468_v34 = vmul.f32 -1.442695, %v715_v32  ;;  %v476_v35 = vmul.f32 -1.442695, %v717_v33  ;;  %v721_v36 = vpop.f32.mrb[3].mxu0  ;;  %v723_v37 = vpop.f32.mrb[3].mxu1 }
  0xe5   :  { %507 = vpow2.f32 %v475_v31  ;;  %v469_v38 = vmul.f32 -1.442695, %v721_v36  ;;  %v477_v39 = vmul.f32 -1.442695, %v723_v37 }
  0xe6   :  { %509 = vpow2.f32 %v468_v34 }
  0xe7   :  { %511 = vpow2.f32 %v476_v35  ;;  %v727_v40 = vpop.f32.mrb[4].mxu0  ;;  %v729_v41 = vpop.f32.mrb[4].mxu1 }
  0xe8   :  { %513 = vpow2.f32 %v469_v38  ;;  %v470_v42 = vmul.f32 -1.442695, %v727_v40  ;;  %v478_v43 = vmul.f32 -1.442695, %v729_v41  ;;  %v733_v44 = vpop.f32.mrb[5].mxu0  ;;  %v735_v45 = vpop.f32.mrb[5].mxu1 }
  0xe9   :  { %515 = vpow2.f32 %v477_v39  ;;  %v471_v46 = vmul.f32 -1.442695, %v733_v44  ;;  %v479_v47 = vmul.f32 -1.442695, %v735_v45 }
  0xea   :  { %517 = vpow2.f32 %v470_v42  ;;  %v305_v42 = vpop.permute.xlu0 %304 }
  0xeb   :  { %519 = vpow2.f32 %v478_v43  ;;  %v739_v48 = vpop.f32.mrb[6].mxu0  ;;  %v741_v49 = vpop.f32.mrb[6].mxu1 }
  0xec   :  { %v502_v50 = vpop.eup %501  ;;  %521 = vpow2.f32 %v471_v46  ;;  %v472_v51 = vmul.f32 -1.442695, %v739_v48  ;;  %v744_v52 = vpop.f32.mrb[7].mxu0  ;;  %v480_v14 = vmul.f32 -1.442695, %v741_v49 }
  0xed   :  { %v746_v53 = vpop.f32.mrb[7].mxu1  ;;  %v504_v54 = vpop.eup %503  ;;  %v229_v55 = vadd.f32 1.0, %v502_v50  ;;  %523 = vpow2.f32 %v479_v47  ;;  %v473_v17 = vmul.f32 -1.442695, %v744_v52 }
  0xee   :  { %v506_v56 = vpop.eup %505  ;;  %v237_v57 = vadd.f32 1.0, %v504_v54  ;;  %525 = vpow2.f32 %v472_v51  ;;  %v481_v20 = vmul.f32 -1.442695, %v746_v53 }
  0xef   :  { %v508_v58 = vpop.eup %507  ;;  %527 = vrcp.f32 %v229_v55  ;;  %v230_v59 = vadd.f32 1.0, %v506_v56 }
  0xf0   :  { %v510_v60 = vpop.eup %509  ;;  %529 = vrcp.f32 %v237_v57  ;;  %v238_v61 = vadd.f32 1.0, %v508_v58 }
  0xf1   :  { %v512_v62 = vpop.eup %511  ;;  %531 = vrcp.f32 %v230_v59  ;;  %v231_v63 = vadd.f32 1.0, %v510_v60 }
  0xf2   :  { %v514_v0 = vpop.eup %513  ;;  %533 = vrcp.f32 %v238_v61  ;;  %v239_v1 = vadd.f32 1.0, %v512_v62 }
  0xf3   :  { %v516_v2 = vpop.eup %515  ;;  %535 = vrcp.f32 %v231_v63  ;;  %v232_v3 = vadd.f32 1.0, %v514_v0 }
  0xf4   :  { %v518_v4 = vpop.eup %517  ;;  %537 = vrcp.f32 %v239_v1  ;;  %v240_v5 = vadd.f32 1.0, %v516_v2 }
  0xf5   :  { %v520_v6 = vpop.eup %519  ;;  %539 = vrcp.f32 %v232_v3  ;;  %v233_v7 = vadd.f32 1.0, %v518_v4 }
  0xf6   :  { %v522_v8 = vpop.eup %521  ;;  %541 = vrcp.f32 %v240_v5  ;;  %v241_v9 = vadd.f32 1.0, %v520_v6 }
  0xf7   :  { %v524_v10 = vpop.eup %523  ;;  %543 = vrcp.f32 %v233_v7  ;;  %v234_v11 = vadd.f32 1.0, %v522_v8 }
  0xf8   :  { %v526_v12 = vpop.eup %525  ;;  %545 = vrcp.f32 %v241_v9  ;;  %v242_v13 = vadd.f32 1.0, %v524_v10 }
  0xf9   :  { %v528_v15 = vpop.eup %527  ;;  %547 = vrcp.f32 %v234_v11  ;;  %v235_v16 = vadd.f32 1.0, %v526_v12 }
  0xfa   :  { %v530_v19 = vpop.eup %529  ;;  %549 = vrcp.f32 %v242_v13  ;;  %v277_v23 = vmul.f32 %v528_v15, %v703_v24 }
  0xfb   :  { %v532_v21 = vpop.eup %531  ;;  %551 = vrcp.f32 %v235_v16  ;;  %v285_v27 = vmul.f32 %v530_v19, %v705_v25 }
  0xfc   :  { %v534_v22 = vpop.eup %533  ;;  %553 = vpow2.f32 %v480_v14  ;;  %v278_v31 = vmul.f32 %v532_v21, %v709_v28  ;;  %v317_v46 = vmul.f32 %v300_v18, %v277_v23  ;;  %v310_v28 = vpop.permute.xlu1 %309 }
  0xfd   :  { %v536_v26 = vpop.eup %535  ;;  %555 = vpow2.f32 %v473_v17  ;;  %v286_v38 = vmul.f32 %v534_v22, %v711_v29  ;;  %v325_v51 = vmul.f32 %v300_v18, %v285_v27 }
  0xfe   :  { %v538_v30 = vpop.eup %537  ;;  %v279_v34 = vmul.f32 %v536_v26, %v715_v32  ;;  %557 = vpow2.f32 %v481_v20  ;;  %v318_v56 = vmul.f32 %v300_v18, %v278_v31 }
  0xff   :  { %v540_v35 = vpop.eup %539  ;;  %v287_v39 = vmul.f32 %v538_v30, %v717_v33  ;;  %v326_v59 = vmul.f32 %v300_v18, %v286_v38 }
 0x100   :  { %v542_v43 = vpop.eup %541  ;;  %v280_v24 = vmul.f32 %v540_v35, %v721_v36  ;;  %v319_v47 = vmul.f32 %v305_v42, %v279_v34  ;;  %v315_v9 = vpop.permute.xlu1 %314 }
 0x101   :  { %v544_v50 = vpop.eup %543  ;;  %v288_v25 = vmul.f32 %v542_v43, %v723_v37  ;;  %v327_v54 = vmul.f32 %v305_v42, %v287_v39 }
 0x102   :  { %v546_v55 = vpop.eup %545  ;;  %v281_v32 = vmul.f32 %v544_v50, %v727_v40  ;;  %v320_v57 = vmul.f32 %v305_v42, %v280_v24  ;;  %v333_v29 = vadd.f32 %v319_v47, %v317_v46  ;;  %v377_v46 = vpop.permute.xlu0 %376 }
 0x103   :  { %v548_v58 = vpop.eup %547  ;;  %v289_v33 = vmul.f32 %v546_v55, %v729_v41  ;;  %v328_v60 = vmul.f32 %v305_v42, %v288_v25  ;;  %v351_v36 = vadd.f32 %v327_v54, %v325_v51 }
 0x104   :  { %v550_v61 = vpop.eup %549  ;;  %v282_v62 = vmul.f32 %v548_v58, %v733_v44  ;;  %v342_v63 = vadd.f32 %v320_v57, %v318_v56  ;;  %v321_v37 = vmul.f32 %v310_v28, %v281_v32 }
 0x105   :  { %v552_v0 = vpop.eup %551  ;;  %v290_v1 = vmul.f32 %v550_v61, %v735_v45  ;;  %v360_v2 = vadd.f32 %v328_v60, %v326_v59  ;;  %v329_v3 = vmul.f32 %v310_v28, %v289_v33 }
 0x106   :  { %v554_v40 = vpop.eup %553  ;;  %v283_v4 = vmul.f32 %v552_v0, %v739_v48  ;;  %v322_v5 = vmul.f32 %v310_v28, %v282_v62  ;;  %v334_v6 = vadd.f32 %v333_v29, %v321_v37 }
 0x107   :  { %v556_v7 = vpop.eup %555  ;;  %v243_v41 = vadd.f32 1.0, %v554_v40  ;;  %v330_v8 = vmul.f32 %v310_v28, %v290_v1  ;;  %v352_v10 = vadd.f32 %v351_v36, %v329_v3 }
 0x108   :  { %v558_v11 = vpop.eup %557  ;;  %v236_v12 = vadd.f32 1.0, %v556_v7  ;;  %v323_v44 = vmul.f32 %v315_v9, %v283_v4  ;;  %v343_v13 = vadd.f32 %v342_v63, %v322_v5 }
 0x109   :  { %559 = vrcp.f32 %v243_v41  ;;  %v244_v14 = vadd.f32 1.0, %v558_v11  ;;  %v361_v15 = vadd.f32 %v360_v2, %v330_v8  ;;  %v607_v41 = vmov 1983009808  }
 0x10a   :  { %561 = vrcp.f32 %v236_v12  ;;  %v335_v45 = vadd.f32 %v334_v6, %v323_v44  ;;  %v413_v8 = vunpack.c.l.s4 %v607_v41 }
 0x10b   :  { %563 = vrcp.f32 %v244_v14 }
 0x10c   :  { %v336_v16 = vrot.slane %v335_v45, 4 }
 0x10e   :  { %v337_v17 = vadd.f32 %v336_v16, %v335_v45 }
 0x110   :  { %v338_v48 = vrot.slane %v337_v17, 2 }
 0x112   :  { %v339_v18 = vadd.f32 %v338_v48, %v337_v17 }
 0x113   :  { %v560_v19 = vpop.eup %559 }
 0x114   :  { %v562_v20 = vpop.eup %561  ;;  %v291_v21 = vmul.f32 %v560_v19, %v741_v49  ;;  %v340_v26 = vrot.slane %v339_v18, 1 }
 0x115   :  { %v564_v22 = vpop.eup %563  ;;  %v284_v23 = vmul.f32 %v562_v20, %v744_v52 }
 0x116   :  { %v292_v27 = vmul.f32 %v564_v22, %v746_v53  ;;  %v331_v30 = vmul.f32 %v315_v9, %v291_v21  ;;  %v341_v38 = vadd.f32 %v340_v26, %v339_v18 }
 0x117   :  { %v324_v31 = vmul.f32 %v315_v9, %v284_v23 }
 0x118   :  { %v332_v34 = vmul.f32 %v315_v9, %v292_v27  ;;  %v353_v35 = vadd.f32 %v352_v10, %v331_v30  ;;  %v379_v49 = vadd.f32 %v377_v46, %v341_v38  ;;  %v415_v9 = vlaneseq }
 0x119   :  { %v344_v39 = vadd.f32 %v343_v13, %v324_v31  ;;  %v414_v10 = vunpack.c.0.s8 %v413_v8 }
 0x11a   :  { %v354_v42 = vrot.slane %v353_v35, 4  ;;  %v362_v43 = vadd.f32 %v361_v15, %v332_v34  ;;  %v483_v32 = vmul.f32 -1.442695, %v379_v49  ;;  %v416_v11 = vshrl.u32 %v415_v9, 7 }
 0x11b   :  { %v345_v24 = vrot.slane %v344_v39, 4 }
 0x11c   :  { %v355_v47 = vadd.f32 %v354_v42, %v353_v35  ;;  %v363_v50 = vrot.slane %v362_v43, 4  ;;  %565 = vpow2.f32 %v483_v32  ;;  %v417_v14 = vsub.s32 %v414_v10, %v416_v11 }
 0x11d   :  { %v346_v25 = vadd.f32 %v345_v24, %v344_v39 }
 0x11e   :  { %v356_v51 = vrot.slane %v355_v47, 2  ;;  %v364_v54 = vadd.f32 %v363_v50, %v362_v43 }
 0x11f   :  { %v347_v52 = vrot.slane %v346_v25, 2 }
 0x120   :  { %v357_v28 = vadd.f32 %v356_v51, %v355_v47  ;;  %v365_v55 = vrot.slane %v364_v54, 2 }
 0x121   :  { %v348_v53 = vadd.f32 %v347_v52, %v346_v25 }
 0x122   :  { %v358_v56 = vrot.slane %v357_v28, 1  ;;  %v366_v57 = vadd.f32 %v365_v55, %v364_v54 }
 0x123   :  { %v349_v29 = vrot.slane %v348_v53, 1 }
 0x124   :  { %v359_v58 = vadd.f32 %v358_v56, %v357_v28  ;;  %v367_v33 = vrot.slane %v366_v57, 1 }
 0x125   :  { %v350_v59 = vadd.f32 %v349_v29, %v348_v53 }
 0x126   :  { %v368_v60 = vadd.f32 %v367_v33, %v366_v57  ;;  %v381_v36 = vadd.f32 %v377_v46, %v359_v58  ;;  %v566_v1 = vpop.eup %565 }
 0x127   :  { %v380_v61 = vadd.f32 %v377_v46, %v350_v59  ;;  %v395_v2 = vadd.f32 1.0, %v566_v1 }
 0x128   :  { %v382_v62 = vadd.f32 %v377_v46, %v368_v60  ;;  %v485_v63 = vmul.f32 -1.442695, %v381_v36 }
 0x129   :  { %v484_v37 = vmul.f32 -1.442695, %v380_v61 }
 0x12a   :  { %567 = vpow2.f32 %v485_v63  ;;  %v486_v0 = vmul.f32 -1.442695, %v382_v62 }
 0x12b   :  { %569 = vpow2.f32 %v484_v37 }
 0x12c   :  { %571 = vpow2.f32 %v486_v0 }
 0x12d   :  { %573 = vrcp.f32 %v395_v2 }
 0x134   :  { %v568_v3 = vpop.eup %567 }
 0x135   :  { %v570_v40 = vpop.eup %569  ;;  %v397_v4 = vadd.f32 1.0, %v568_v3 }
 0x136   :  { %v572_v5 = vpop.eup %571  ;;  %v396_v6 = vadd.f32 1.0, %v570_v40 }
 0x137   :  { %v398_v7 = vadd.f32 1.0, %v572_v5  ;;  %575 = vrcp.f32 %v397_v4  ;;  %v574_v12 = vpop.eup %573 }
 0x138   :  { %577 = vrcp.f32 %v396_v6 }
 0x139   :  { %579 = vrcp.f32 %v398_v7 }
 0x141   :  { %v576_v44 = vpop.eup %575 }
 0x142   :  { %v578_v13 = vpop.eup %577 }
 0x143   :  { %v580_v15 = vpop.eup %579  ;;  %v411_v45 = vcombine.low %v574_v12, %v578_v13 }
 0x144   :  { %v419_v16 = vcombine.low %v576_v44, %v580_v15 }
 0x145   :  { %v418_v48 = vrot.slane %v411_v45, %v417_v14 }
 0x146   :  { %v426_v17 = vrot.slane %v419_v16, %v417_v14 }
 0x148   :  { %v431_v18 = vrot.slane %v426_v17, 7 }
 0x14a   :  { %v433_v19 = vsel %vm432_vm2, %v431_v18, %v418_v48 }
 0x14b   :  { %v435_v20 = vsel %vm434_vm3, %v431_v18, %v433_v19 }
 0x14c   :  { %v437_v21 = vsel %vm436_vm4, %v431_v18, %v435_v20 }
 0x14d   :  { %v439_v22 = vsel %vm438_vm5, %v431_v18, %v437_v21 }
 0x14e   :  { %441 = vst [vmem:[#allocation3] sm:$0xf] %v439_v22 }
 0x14f   :  { %592 = shalt.err (!%p589_p4)
}
 0x150   :  { %s593_s27 = scalar_lea.hbm %s783_s4, 64 }
 0x151   :  { %p594_p5 = scmp.ne.s32.totalorder %s783_s4, %s593_s27  ;;  %p597_p6 = scmp.lt.u32.totalorder %s593_s27, %s783_s4 }
 0x153   :  { %p599_p7 = pnand %p597_p6, %p594_p5 }
 0x155   :  { %602 = shalt.err (!%p599_p7)
}
 0x156   :  { %451 = dma.vmem_to_hbm [thread:$0]  %s449_s24, 64, %s783_s4, [#allocation4]  }
 0x157   :  { %603 = dma.done.wait [#allocation4], 64  }
 0x158   :  { %604 = vsyncadd [#allocation4], 4294967232 }
 0x159   :  { %455 = vsyncpa [#allocation4], 1 }

</bundles_post_ra>
